<compile_context>
chip_gen: v7x
topology: tpu7x:2x2x1
jax: 0.10.0
libtpu: 0.0.40
codegen_flags: <defaults>
</compile_context>

<pallas_src>
import jax
import jax.numpy as jnp
from jax.experimental import pallas as pl
from jax.experimental.pallas import tpu as pltpu


# ----------------------------------------------------------------------------- kernel
def policy_kernel(xT_ref, w1_ref, b1_ref, w2_ref, b2_ref, meanT_ref):
    # fc1 (transposed): h = W1 @ x^T + b1 -> (H, tile_B), batch on lanes.
    # bf16 inputs, f32 MXU accumulation.
    h = jnp.dot(w1_ref[...], xT_ref[...], preferred_element_type=jnp.float32)
    h = jnp.maximum(h + b1_ref[...], 0.0)                       # ReLU, f32
    # fc2_mean (transposed): mean^T = W2 @ h + b2 -> (A, tile_B).
    # Kept entirely in f32 (no bf16 repack of h) -- better numerics, kernel is
    # memory-bound so the tiny extra matmul cost is invisible.
    m = jnp.dot(w2_ref[...], h, preferred_element_type=jnp.float32)
    meanT_ref[...] = (m + b2_ref[...]).astype(meanT_ref.dtype)


# ----------------------------------------------------------------------------- pallas_call wrapper
def _policy_meanT_call(xT, w1c, b1c, w2c, b2c, tb):
    """xT: (S, b_pad) bf16 with b_pad % tb == 0.  Returns mean^T (A, b_pad) f32."""
    S, b_pad = xT.shape
    H = w1c.shape[0]
    A = w2c.shape[0]
    grid = (b_pad // tb,)
    return pl.pallas_call(
        policy_kernel,
        out_shape=jax.ShapeDtypeStruct((A, b_pad), jnp.float32),
        grid=grid,
        in_specs=[
            pl.BlockSpec((S, tb), lambda i: (0, i)),    # states: tiled along batch (lanes)
            pl.BlockSpec((H, S), lambda i: (0, 0)),     # W1 resident in VMEM
            pl.BlockSpec((H, 1), lambda i: (0, 0)),     # b1 resident
            pl.BlockSpec((A, H), lambda i: (0, 0)),     # W2 resident (f32)
            pl.BlockSpec((A, 1), lambda i: (0, 0)),     # b2 resident
        ],
        out_specs=pl.BlockSpec((A, tb), lambda i: (0, i)),  # lane-dense stores
        compiler_params=pltpu.CompilerParams(
            dimension_semantics=("parallel",)),         # shard batch over v7x's 2 TCs
    )(xT, w1c, b1c, w2c, b2c)


def _round_up(n, m):
    return ((n + m - 1) // m) * m


def _choose_tiling(batch, tile_b_max):
    """Tile the batch: multiple of 128, as large as tile_b_max allows, but keep
    >= 2 grid steps whenever the batch exceeds one vreg-row so the parallel axis
    can use both v7x TensorCores."""
    tile_b_max = max(int(tile_b_max), 128)
    b_aligned = _round_up(max(batch, 1), 128)
    tb = min(tile_b_max, b_aligned)
    if b_aligned > 128 and tb == b_aligned:
        tb = _round_up(b_aligned // 2, 128)
    b_pad = _round_up(b_aligned, tb)
    return tb, b_pad


def _prep_params(w1, b1, w2, b2):
    H = w1.shape[0]
    A = w2.shape[0]
    w1c = w1.astype(jnp.bfloat16)                 # fc1 weight: bf16 MXU path
    b1c = b1.reshape(H, 1).astype(jnp.float32)    # biases broadcast over lanes
    w2c = w2.astype(jnp.float32)                  # fc2 stays f32 (no h repack)
    b2c = b2.reshape(A, 1).astype(jnp.float32)
    return w1c, b1c, w2c, b2c


# ----------------------------------------------------------------------------- public entry points
def policy_forward_t(xT, w1, b1, w2, b2, *, tile_b_max=8192):
    """Relayout-free production path.

    xT: (state_space, B_pad) bfloat16 states with B_pad a multiple of 128, i.e.
        already laid out with the batch on the 128-lane axis.
    Returns (mean^T (action_space, B_pad) float32, scale=5.0).  The consumer
    slices/transposes at a fusion-friendly point -- no wrapper HBM passes here.
    """
    S, b_pad = xT.shape
    if b_pad % 128 != 0:
        raise ValueError("lane (batch) axis of xT must be a multiple of 128")
    tile_b_max = max(int(tile_b_max), 128)
    n = b_pad // 128
    steps = max(2 if n >= 2 else 1, pl.cdiv(b_pad, tile_b_max))
    while n % steps:                               # pick a tile that divides b_pad
        steps += 1
    tb = b_pad // steps
    w1c, b1c, w2c, b2c = _prep_params(w1, b1, w2, b2)
    meanT = _policy_meanT_call(xT.astype(jnp.bfloat16), w1c, b1c, w2c, b2c, tb)
    return meanT, jnp.float32(5.0)


def policy_forward(x, w1, b1, w2, b2, *, tile_b_max=8192):
    """Torch-compatible forward pass of Policy.

    x:  (B, S) float32 batch of states
    w1: (H, S) fc1 weight (torch layout: out_features x in_features), b1: (H,)
    w2: (A, H) fc2_mean weight, b2: (A,)
    Returns (action_mean (B, A) float32, scale=5.0) mirroring Normal(mean, 5).

    The pad+transpose+cast of x and the final (A,B)->(B,A) transpose are layout
    plumbing (single fused XLA passes under jit); producers/consumers that can
    work in the transposed layout should use policy_forward_t instead.
    """
    B, S = x.shape
    tb, b_pad = _choose_tiling(B, tile_b_max)
    # One fused pass: pad batch, put it on the lane axis, cast to bf16.
    xT = jnp.pad(x, ((0, b_pad - B), (0, 0))).T.astype(jnp.bfloat16)   # (S, b_pad)
    w1c, b1c, w2c, b2c = _prep_params(w1, b1, w2, b2)
    meanT = _policy_meanT_call(xT, w1c, b1c, w2c, b2c, tb)
    mean = meanT[:, :B].T                                              # (B, A)
    # Module passes self.sigmasquared (=5) directly as the Normal scale; we mirror
    # that (scale=5.0).  Note the name suggests variance -- if variance was
    # intended the caller should use sqrt(5) as the scale.
    # TODO(synk): Normal-distribution object (sampling / log_prob) has no Pallas
    # equivalent; returning (mean, scale) instead.
    return mean, jnp.float32(5.0)


# ----------------------------------------------------------------------------- test
if __name__ == "__main__":
    # Small shapes consistent with the module (low-dim continuous-control env),
    # batched over rollout timesteps.  batch=384 pads to 512 -> 2 parallel tiles.
    batch = 384
    state_space = 8
    action_space = 4
    hidden = 64

    key = jax.random.PRNGKey(0)
    kx, kw1, kw2 = jax.random.split(key, 3)

    # init_weights(): normal weights, zero biases (torch layout: out x in).
    x = jax.random.normal(kx, (batch, state_space), dtype=jnp.float32)
    w1 = jax.random.normal(kw1, (hidden, state_space), dtype=jnp.float32)
    b1 = jnp.zeros((hidden,), dtype=jnp.float32)
    w2 = jax.random.normal(kw2, (action_space, hidden), dtype=jnp.float32)
    b2 = jnp.zeros((action_space,), dtype=jnp.float32)

    fwd = jax.jit(policy_forward)
    mean, scale = fwd(x, w1, b1, w2, b2)
    jax.block_until_ready(mean)
    assert mean.shape == (batch, action_space)

    # Reference with matching numerics: bf16 x / W1 for fc1 (f32 accumulation),
    # f32 hidden activations and f32 fc2 (the kernel no longer repacks h to bf16).
    xb = x.astype(jnp.bfloat16)
    w1b = w1.astype(jnp.bfloat16)
    h_ref = jnp.maximum(
        jnp.dot(xb, w1b.T, preferred_element_type=jnp.float32) + b1, 0.0)
    ref = jnp.dot(h_ref, w2.T, precision=jax.lax.Precision.HIGHEST) + b2
    assert jnp.allclose(mean, ref, atol=1e-1, rtol=2e-2), \
        "mismatch vs matched-precision reference"

    # Loose sanity check against the full-f32 PyTorch-equivalent math
    # (bf16 rounding of fc1 inputs is the only precision loss).
    ref_f32 = jnp.maximum(x @ w1.T + b1, 0.0) @ w2.T + b2
    assert jnp.allclose(mean, ref_f32, atol=0.5, rtol=5e-2), "mismatch vs f32 reference"

    # Exercise the relayout-free transposed production path as well.
    b_pad = ((batch + 255) // 256) * 256
    xT = jnp.pad(x, ((0, b_pad - batch), (0, 0))).T.astype(jnp.bfloat16)
    meanT, scale_t = policy_forward_t(xT, w1, b1, w2, b2)
    jax.block_until_ready(meanT)
    assert jnp.allclose(meanT[:, :batch].T, mean, atol=1e-3, rtol=1e-3), \
        "transposed path mismatch"

    assert float(scale) == 5.0 and float(scale_t) == 5.0
    print("KERNEL_OK")
</pallas_src>

<mosaic_0001>
module attributes {stable_mosaic.version = 11 : i64} {
  func.func @policy_kernel(%arg0: i32, %arg1: memref<8x256xbf16, #tpu.memory_space<vmem>>, %arg2: memref<64x8xbf16, #tpu.memory_space<vmem>>, %arg3: memref<64x1xf32, #tpu.memory_space<vmem>>, %arg4: memref<4x64xf32, #tpu.memory_space<vmem>>, %arg5: memref<4x1xf32, #tpu.memory_space<vmem>>, %arg6: memref<4x256xf32, #tpu.memory_space<vmem>>) attributes {dimension_semantics = [#tpu.dimension_semantics<parallel>], iteration_bounds = array<i64: 2>, scalar_prefetch = 0 : i64, scratch_operands = 0 : i64, tpu.core_type = #tpu.core_type<tc>, window_params = [{transform_indices = @transform_0, window_bounds = array<i64: 8, 256>}, {pipeline_mode = #tpu.pipeline_mode<synchronous>, transform_indices = @transform_1, window_bounds = array<i64: 64, 8>}, {pipeline_mode = #tpu.pipeline_mode<synchronous>, transform_indices = @transform_2, window_bounds = array<i64: 64, 1>}, {pipeline_mode = #tpu.pipeline_mode<synchronous>, transform_indices = @transform_3, window_bounds = array<i64: 4, 64>}, {pipeline_mode = #tpu.pipeline_mode<synchronous>, transform_indices = @transform_4, window_bounds = array<i64: 4, 1>}, {transform_indices = @transform_5, window_bounds = array<i64: 4, 256>}]} {
    %c0 = arith.constant 0 : index
    %c0_0 = arith.constant 0 : index
    %0 = vector.load %arg2[%c0, %c0_0] : memref<64x8xbf16, #tpu.memory_space<vmem>>, vector<64x8xbf16>
    %c0_1 = arith.constant 0 : index
    %c0_2 = arith.constant 0 : index
    %1 = vector.load %arg1[%c0_1, %c0_2] : memref<8x256xbf16, #tpu.memory_space<vmem>>, vector<8x256xbf16>
    %cst = arith.constant dense<0.000000e+00> : vector<64x256xf32>
    %2 = tpu.matmul %0, %1, %cst {dimension_numbers = #tpu.dot_dimension_numbers<[1], [0], [0], [1], [0, 0, 1, 1], [], []>} : vector<64x8xbf16>, vector<8x256xbf16>, vector<64x256xf32> -> vector<64x256xf32>
    %c0_3 = arith.constant 0 : index
    %c0_4 = arith.constant 0 : index
    %3 = vector.load %arg3[%c0_3, %c0_4] : memref<64x1xf32, #tpu.memory_space<vmem>>, vector<64x1xf32>
    %4 = vector.broadcast %3 : vector<64x1xf32> to vector<64x256xf32>
    %5 = arith.addf %2, %4 : vector<64x256xf32>
    %cst_5 = arith.constant 0.000000e+00 : f32
    %6 = vector.broadcast %cst_5 : f32 to vector<64x256xf32>
    %7 = arith.maximumf %5, %6 : vector<64x256xf32>
    %c0_6 = arith.constant 0 : index
    %c0_7 = arith.constant 0 : index
    %8 = vector.load %arg4[%c0_6, %c0_7] : memref<4x64xf32, #tpu.memory_space<vmem>>, vector<4x64xf32>
    %cst_8 = arith.constant dense<0.000000e+00> : vector<4x256xf32>
    %9 = tpu.matmul %8, %7, %cst_8 {dimension_numbers = #tpu.dot_dimension_numbers<[1], [0], [0], [1], [0, 0, 1, 1], [], []>} : vector<4x64xf32>, vector<64x256xf32>, vector<4x256xf32> -> vector<4x256xf32>
    %c0_9 = arith.constant 0 : index
    %c0_10 = arith.constant 0 : index
    %10 = vector.load %arg5[%c0_9, %c0_10] : memref<4x1xf32, #tpu.memory_space<vmem>>, vector<4x1xf32>
    %11 = vector.broadcast %10 : vector<4x1xf32> to vector<4x256xf32>
    %12 = arith.addf %9, %11 : vector<4x256xf32>
    %c0_11 = arith.constant 0 : index
    %c0_12 = arith.constant 0 : index
    %13 = vector.load %arg6[%c0_11, %c0_12] : memref<4x256xf32, #tpu.memory_space<vmem>>, vector<4x256xf32>
    tpu.vector_store %arg6[%c0_11, %c0_12], %12 {strides = array<i32>} : memref<4x256xf32, #tpu.memory_space<vmem>>, vector<4x256xf32>,
    return
  }
  func.func @transform_0(%arg0: i32) -> (i32, i32) {
    %c0_i32 = arith.constant 0 : i32
    %c0_i32_0 = arith.constant 0 : i32
    return %c0_i32, %arg0 : i32, i32
  }
  func.func @transform_1(%arg0: i32) -> (i32, i32) {
    %c0_i32 = arith.constant 0 : i32
    %c0_i32_0 = arith.constant 0 : i32
    %c0_i32_1 = arith.constant 0 : i32
    return %c0_i32, %c0_i32_0 : i32, i32
  }
  func.func @transform_2(%arg0: i32) -> (i32, i32) {
    %c0_i32 = arith.constant 0 : i32
    %c0_i32_0 = arith.constant 0 : i32
    %c0_i32_1 = arith.constant 0 : i32
    return %c0_i32, %c0_i32_0 : i32, i32
  }
  func.func @transform_3(%arg0: i32) -> (i32, i32) {
    %c0_i32 = arith.constant 0 : i32
    %c0_i32_0 = arith.constant 0 : i32
    %c0_i32_1 = arith.constant 0 : i32
    return %c0_i32, %c0_i32_0 : i32, i32
  }
  func.func @transform_4(%arg0: i32) -> (i32, i32) {
    %c0_i32 = arith.constant 0 : i32
    %c0_i32_0 = arith.constant 0 : i32
    %c0_i32_1 = arith.constant 0 : i32
    return %c0_i32, %c0_i32_0 : i32, i32
  }
  func.func @transform_5(%arg0: i32) -> (i32, i32) {
    %c0_i32 = arith.constant 0 : i32
    %c0_i32_0 = arith.constant 0 : i32
    return %c0_i32, %arg0 : i32, i32
  }
}

</mosaic_0001>

<bundles_post_ra>
// kernel: policy_forward.1
= control target key start
LH: loop header
LB: loop body
LE: loop exit
PB: predicated region body
PF: predicated region fallthrough
CT: control target
= control target key end

     0   :  { %s662_s18 = smov 0   ;;  %s732_s0 = inlined_call_operand.vmem [shape: bf16[8,512], index: 0, kind: input, shape index: {}]   ;;  %s733_s1 = inlined_call_operand.vmem [shape: bf16[64,8], index: 1, kind: input, shape index: {}]   ;;  %s734_s2 = inlined_call_operand.vmem [shape: f32[64,1], index: 2, kind: input, shape index: {}]   ;;  %s735_s3 = inlined_call_operand.vmem [shape: f32[4,64], index: 3, kind: input, shape index: {}]   ;;  %s736_s4 = inlined_call_operand.vmem [shape: f32[4,1], index: 4, kind: input, shape index: {}]   ;;  %s737_s5 = inlined_call_operand.vmem [shape: f32[4,512], index: 5, kind: output, shape index: {}]  }
   0x1 LB: > { %s563_s19 = sadd.s32 4294967295, %s628_s18   ;;  %p567_p0 = scmp.ge.s32.totalorder %s628_s18, 1  ;;  %s628_s18 = sphi %s662_s18, %s15_s18  }
   0x2   : > { %p188_p1 = scmp.lt.s32.totalorder %s628_s18, 3 }
   0x4   : > { %p189_p2 = pnand %p567_p0, %p188_p1 }
   0x5   : > { %s568_s20 = sshll.u32 (!%p189_p2), %s563_s19, 1  ;;  %v630_v0 = vmov (!%p189_p2), 0   ;;  %v238_v1 = vld [vmem:[%s734_s2] sm:$0xff] (!%p189_p2)  ;;  %v240_v2 = vld [vmem:[%s734_s2 + $0x10] sm:$0xff] (!%p189_p2)  ;;  %v239_v3 = vld [vmem:[%s734_s2 + $0x8] sm:$0xff] (!%p189_p2)  ;;  %vm324_vm0 = vcmask (!%p189_p2), 1043456  }
   0x6   : > { %192 = sbr.rel (%p189_p2) target bundleno = 482 (0x1e2), region = 40  ;;  %p217_p3 = scmp.lt.s32.totalorder (!%p189_p2), %s568_s20, 3  ;;  %363 = vmatprep.mubr.bf16.mxu0 (!%p189_p2), %v630_v0  ;;  %383 = vmatprep.mubr.bf16.mxu1 (!%p189_p2), %v630_v0  ;;  %v241_v7 = vld [vmem:[%s734_s2 + $0x18] sm:$0xff] (!%p189_p2)  ;;  %v618_v9 = vld [vmem:[%s733_s1] sm:$0xff] (!%p189_p2)   ;;  %v619_v10 = vld [vmem:[%s733_s1 + $0x10] sm:$0xff] (!%p189_p2)   ;;  %vm311_vm1 = vcmask (!%p189_p2), 64512  }
   0x7   : > { %614 = vset.pattern.permute.xlu0 (!%p189_p2), %v630_v0  ;;  %615 = vset.pattern.permute.xlu1 (!%p189_p2), %v630_v0  ;;  %v242_v11 = vld [vmem:[%s734_s2 + $0x20] sm:$0xff] (!%p189_p2)  ;;  %v243_v12 = vld [vmem:[%s734_s2 + $0x28] sm:$0xff] (!%p189_p2)  ;;  %v244_v13 = vld [vmem:[%s734_s2 + $0x30] sm:$0xff] (!%p189_p2)  ;;  %v631_v18 = vmov (!%p189_p2), 0.0   ;;  %vm427_vm2 = vcmask (!%p189_p2), 523264  }
   0x8   : > { %248 = vperm.xlu0 (!%p189_p2), %614, %v238_v1   ;;  %258 = vperm.xlu1 (!%p189_p2), %615, %v240_v2   ;;  %v245_v14 = vld [vmem:[%s734_s2 + $0x38] sm:$0xff] (!%p189_p2)  ;;  %v620_v15 = vld [vmem:[%s733_s1 + $0x8] sm:$0xff] (!%p189_p2)   ;;  %v421_v17 = vld [vmem:[%s736_s4] sm:$0xf] (!%p189_p2) }
   0x9   : > { %v621_v16 = vld [vmem:[%s733_s1 + $0x18] sm:$0xff] (!%p189_p2)  }
   0xc   : > { %253 = vperm.xlu0 (!%p189_p2), %614, %v239_v3   ;;  %263 = vperm.xlu1 (!%p189_p2), %615, %v241_v7  }
   0xd   : > { %s739_s20 = smov (!%p217_p3, %s568_s20), 3 }
   0xe   : > { %s569_s23 = sshll.u32 %s739_s20, 2 }
   0xf   : > { %s220_s28 = scalar_lea.vmem %s732_s0, %s569_s23  ;;  %s226_s8 = scalar_lea.vmem %s737_s5, %s569_s23 }
  0x10   : > { %v237_v4 = vld [vmem:[%s220_s28] sm:$0xff]  ;;  %268 = vperm.xlu0 %614, %v242_v11   ;;  %273 = vperm.xlu1 %615, %v243_v12  }
  0x11   : > { %v577_v5 = vcombine.high %v237_v4, %v237_v4  ;;  %v576_v6 = vcombine.low %v237_v4, %v237_v4 }
  0x13   : > { %578 = vmatprep.subr.msk.bf16.mxu0 %vm324_vm0, %v577_v5  ;;  %602 = vmatprep.subr.msk.bf16.mxu1 %vm324_vm0, %v577_v5  ;;  %v326_v8 = vsel %vm324_vm0, %v576_v6, 0 }
  0x14   : > { %332 = vmatpush1.bf16.msra.mxu0 %v326_v8  ;;  %603 = vmatpush1.bf16.msra.mxu1 %v326_v8 }
  0x15   : > { %278 = vperm.xlu0 %614, %v244_v13   ;;  %283 = vperm.xlu1 %615, %v245_v14  }
  0x17   : > { %579 = vmatmul.mubr.msk.bf16.vlgmr.msra.gmra.mrb[0].mxu0 %vm311_vm1, %v618_v9  ;;  %581 = vmatmul.mubr.msk.bf16.vlgmr.msra.gmra.mrb[0].mxu1 %vm311_vm1, %v619_v10 }
  0x18   : > { %373 = vmatprep.mubr.bf16.mxu0 %v630_v0  ;;  %393 = vmatprep.mubr.bf16.mxu1 %v630_v0 }
  0x19   : > { %424 = vperm.xlu0 %614, %v421_v17  }
  0x1f   : > { %580 = vmatmul.mubr.msk.bf16.gmra.mrb[4].mxu0 %vm311_vm1, %v620_v15  ;;  %582 = vmatmul.mubr.msk.bf16.gmra.mrb[4].mxu1 %vm311_vm1, %v621_v16 }
  0x20   : > { %495 = vmatprep.mubr.f32.mxu1 %v631_v18 }
  0x87   : > { %v249_v19 = vpop.permute.xlu0 %248  ;;  %v259_v20 = vpop.permute.xlu1 %258 }
  0x8b   : > { %v254_v21 = vpop.permute.xlu0 %253  ;;  %v264_v22 = vpop.permute.xlu1 %263 }
  0x8f   : > { %v269_v23 = vpop.permute.xlu0 %268  ;;  %v274_v24 = vpop.permute.xlu1 %273 }
  0x94   : > { %v279_v49 = vpop.permute.xlu0 %278  ;;  %v284_v52 = vpop.permute.xlu1 %283 }
  0xea   : > { %v365_v25 = vpop.f32.mrb[0].mxu0  ;;  %v385_v26 = vpop.f32.mrb[0].mxu1 }
  0xeb   : > { %v366_v27 = vadd.f32 %v365_v25, %v249_v19  ;;  %v386_v28 = vadd.f32 %v385_v26, %v269_v23  ;;  %v367_v29 = vpop.f32.mrb[1].mxu0  ;;  %v387_v30 = vpop.f32.mrb[1].mxu1 }
  0xec   : > { %v368_v31 = vadd.f32 %v367_v29, %v249_v19  ;;  %v388_v32 = vadd.f32 %v387_v30, %v269_v23  ;;  %v369_v33 = vpop.f32.mrb[2].mxu0  ;;  %v389_v34 = vpop.f32.mrb[2].mxu1  ;;  %v420_v19 = vld [vmem:[%s735_s3] sm:$0xf] }
  0xed   : > { %v412_v35 = vmax.f32 %v386_v28, 0.0  ;;  %v370_v36 = vadd.f32 %v369_v33, %v254_v21  ;;  %v390_v37 = vadd.f32 %v389_v34, %v274_v24  ;;  %v371_v38 = vpop.f32.mrb[3].mxu0  ;;  %v391_v39 = vpop.f32.mrb[3].mxu1  ;;  %v404_v43 = vmax.f32 %v366_v27, 0.0 }
  0xee   : > { %v413_v40 = vmax.f32 %v388_v32, 0.0  ;;  %v372_v41 = vadd.f32 %v371_v38, %v254_v21  ;;  %v392_v42 = vadd.f32 %v391_v39, %v274_v24  ;;  %v405_v46 = vmax.f32 %v368_v31, 0.0 }
  0xef   : > { %v406_v44 = vmax.f32 %v370_v36, 0.0  ;;  %v414_v45 = vmax.f32 %v390_v37, 0.0 }
  0xf0   : > { %v407_v47 = vmax.f32 %v372_v41, 0.0  ;;  %v415_v48 = vmax.f32 %v392_v42, 0.0 }
  0xf1   : > { %v588_v50 = vpack.c.bf16 %v406_v44, %v404_v43  ;;  %v596_v51 = vpack.c.bf16 %v414_v45, %v412_v35 }
  0xf2   : > { %v586_v53 = vpack.c.bf16 %v407_v47, %v405_v46  ;;  %v594_v54 = vpack.c.bf16 %v415_v48, %v413_v40  ;;  %v375_v55 = vpop.f32.mrb[4].mxu0  ;;  %v395_v56 = vpop.f32.mrb[4].mxu1 }
  0xf3   : > { %v376_v57 = vadd.f32 %v375_v55, %v259_v20  ;;  %v396_v58 = vadd.f32 %v395_v56, %v279_v49  ;;  %v377_v59 = vpop.f32.mrb[5].mxu0  ;;  %v397_v60 = vpop.f32.mrb[5].mxu1 }
  0xf4   : > { %v378_v61 = vadd.f32 %v377_v59, %v259_v20  ;;  %v398_v62 = vadd.f32 %v397_v60, %v279_v49  ;;  %v379_v63 = vpop.f32.mrb[6].mxu0  ;;  %v399_v0 = vpop.f32.mrb[6].mxu1  ;;  %587 = vmatprep.subr.bf16.mxu1 %v586_v53 }
  0xf5   : > { %v380_v1 = vadd.f32 %v379_v63, %v264_v22  ;;  %v400_v2 = vadd.f32 %v399_v0, %v284_v52  ;;  %v381_v3 = vpop.f32.mrb[7].mxu0  ;;  %v401_v4 = vpop.f32.mrb[7].mxu1  ;;  %589 = vmatpush1.bf16.msra.mxu1 %v588_v50  ;;  %v408_v7 = vmax.f32 %v376_v57, 0.0  ;;  %v416_v8 = vmax.f32 %v396_v58, 0.0 }
  0xf6   : > { %v382_v5 = vadd.f32 %v381_v3, %v264_v22  ;;  %v402_v6 = vadd.f32 %v401_v4, %v284_v52  ;;  %v409_v11 = vmax.f32 %v378_v61, 0.0  ;;  %v417_v12 = vmax.f32 %v398_v62, 0.0  ;;  %v425_v20 = vpop.permute.xlu0 %424 }
  0xf7   : > { %v410_v9 = vmax.f32 %v380_v1, 0.0  ;;  %v418_v10 = vmax.f32 %v400_v2, 0.0 }
  0xf8   : > { %v411_v13 = vmax.f32 %v382_v5, 0.0  ;;  %v419_v14 = vmax.f32 %v402_v6, 0.0 }
  0xf9   : > { %v592_v15 = vpack.c.bf16 %v410_v9, %v408_v7  ;;  %v600_v16 = vpack.c.bf16 %v418_v10, %v416_v8 }
  0xfa   : > { %v590_v17 = vpack.c.bf16 %v411_v13, %v409_v11  ;;  %v598_v18 = vpack.c.bf16 %v419_v14, %v417_v12 }
  0xfc   : > { %591 = vmatprep.subr.bf16.mxu1 %v590_v17 }
  0xfd   : > { %593 = vmatpush1.bf16.msra.mxu1 %v592_v15 }
  0xfe   : > { %595 = vmatprep.subr.bf16.mxu1 %v594_v54 }
 0x101   : > { %597 = vmatpush1.bf16.msra.mxu1 %v596_v51 }
 0x102   : > { %599 = vmatprep.subr.bf16.mxu1 %v598_v18 }
 0x105   : > { %601 = vmatpush1.bf16.msra.mxu1 %v600_v16 }
 0x108   : > { %583 = vmatmul.mubr.msk.f32.vlgmr.msra.gmra.mrb[8].mxu1 %vm427_vm2, %v420_v19 }
 0x1db   : > { %v497_v21 = vpop.f32.mrb[8].mxu1 }
 0x1dc   : > { %v498_v22 = vadd.f32 %v497_v21, %v425_v20  ;;  %v499_v23 = vpop.f32.mrb[9].mxu1 }
 0x1dd   : > { %v500_v24 = vadd.f32 %v499_v23, %v425_v20 }
 0x1df   : > { %v504_v25 = vcombine.low %v498_v22, %v500_v24 }
 0x1e1   : > { %506 = vst [vmem:[%s226_s8] sm:$0xff] %v504_v25 }
 0x1e2 PF: > { %s15_s18 = sadd.s32 1, %s628_s18  }
 0x1e3   : > { %p12_p4 = scmp.ge.s32.totalorder %s15_s18, 4  }
 0x1e5   :  { %14 = sbr.rel (!%p12_p4) target bundleno = 1 (0x1), region = 70 }

</bundles_post_ra>
